<compile_context>
chip_gen: v5e
topology: v5e:2x2
jax: 0.10.0
libtpu: 0.0.40
codegen_flags: <defaults>
</compile_context>

<pallas_src>
import functools
from collections import defaultdict

import jax
import jax.numpy as jnp
from jax.experimental import pallas as pl
from jax.experimental.pallas import tpu as pltpu

TILE_M = 512   # output-row tile cap (>=2 M blocks once n_tgt > 512 -> v7x 2 TCs)
TILE_K = 512   # reduction tile cap


def _round_up(v, m):
    return ((v + m - 1) // m) * m


def _even_tiles(size, max_tile, align):
    """Tile size dividing `size` with minimal overshoot (max_tile must be a
    multiple of align).  Returns (tile, n_blocks, padded_size)."""
    n_blocks = max(1, -(-size // max_tile))
    tile = _round_up(-(-size // n_blocks), align)
    return tile, n_blocks, tile * n_blocks


def _default_vmem_limit():
    cap = 128 * 1024 * 1024
    try:
        info = pltpu.get_tpu_info()
        cap = int(getattr(info, "vmem_capacity_bytes", cap) or cap)
    except Exception:
        pass
    # v5e/v6e (128 MiB physical) -> 64 MiB; v7x (64 MiB physical) -> ~45 MiB,
    # leaving headroom for Mosaic internal scratch.
    return max(32 * 1024 * 1024, min(64 * 1024 * 1024, int(cap * 0.7)))


def _pick_tn(feat, tm, tk, operand_itemsize, vmem_limit):
    """Prefer a single N block spanning the full padded feature width (so the
    large adjacency operand is streamed from HBM exactly once); fall back to an
    even 128-granule split only if the VMEM budget would be exceeded."""
    budget = int(vmem_limit * 0.75)
    fixed = 2 * tm * tk * operand_itemsize              # double-buffered adjacency tiles
    per_tn = 2 * tk * operand_itemsize + 3 * tm * 4     # X (2x) + out (2x) + f32 acc
    max_tn = (budget - fixed) // per_tn
    max_tn = max(128, (max_tn // 128) * 128)
    max_tn = min(max_tn, _round_up(feat, 128))
    return _even_tiles(feat, max_tn, 128)


# ----------------------------------------------------------------------------
# Pallas kernel: out = relu( A_stacked @ X_stacked )   (1/div folded into A)
# ----------------------------------------------------------------------------
def _gcn_matmul_kernel(a_ref, x_ref, o_ref, acc_ref, *, apply_relu):
    @pl.when(pl.program_id(2) == 0)
    def _init():
        acc_ref[...] = jnp.zeros_like(acc_ref)

    acc_ref[...] += jnp.dot(a_ref[...], x_ref[...],
                            preferred_element_type=jnp.float32)

    @pl.when(pl.program_id(2) == pl.num_programs(2) - 1)
    def _finalize():
        r = acc_ref[...]
        if apply_relu:
            # The module computes ReLU(out/div) unconditionally; 1/div is
            # folded into the edge weights and the optional second ReLU is
            # idempotent, so a single epilogue ReLU covers both.
            r = jnp.maximum(r, 0.0)
        o_ref[...] = r.astype(o_ref.dtype)


def _fused_matmul(adj_p, x_p, *, tm, tn, tk, apply_relu, vmem_limit):
    m_pad, k_pad = adj_p.shape
    _, n_pad = x_p.shape
    nm, nn, nk = m_pad // tm, n_pad // tn, k_pad // tk
    grid = (nm, nn, nk)

    flops = 2 * m_pad * n_pad * k_pad
    # Adjacency is re-read once per N block, X once per M block.
    bytes_accessed = (adj_p.size * adj_p.dtype.itemsize * nn
                      + x_p.size * x_p.dtype.itemsize * nm
                      + m_pad * n_pad * 4)

    return pl.pallas_call(
        functools.partial(_gcn_matmul_kernel, apply_relu=apply_relu),
        out_shape=jax.ShapeDtypeStruct((m_pad, n_pad), jnp.float32),
        grid=grid,
        in_specs=[
            pl.BlockSpec((tm, tk), lambda i, j, k: (i, k)),   # stacked adjacency
            pl.BlockSpec((tk, tn), lambda i, j, k: (k, j)),   # stacked source feats
        ],
        out_specs=pl.BlockSpec((tm, tn), lambda i, j, k: (i, j)),
        scratch_shapes=[pltpu.VMEM((tm, tn), jnp.float32)],
        compiler_params=pltpu.CompilerParams(
            dimension_semantics=("parallel", "parallel", "arbitrary"),
            vmem_limit_bytes=vmem_limit,
        ),
        cost_estimate=pl.CostEstimate(flops=flops, transcendentals=0,
                                      bytes_accessed=bytes_accessed),
    )(adj_p, x_p)


# ----------------------------------------------------------------------------
# Precompute (module __init__ equivalent): per-target stacked, normalized,
# 1/div-scaled adjacency.  Built ONCE per graph, reused across forwards.
# ----------------------------------------------------------------------------
def _build_stacked_adj(relations, x_dict, div_tgt, n_tgt, m_pad, k_pad,
                       src_offsets, dtype):
    adj = jnp.zeros((m_pad, k_pad), jnp.float32)
    inv_div = 1.0 / float(div_tgt)
    for src, ei in relations:
        si = ei[0].reshape(-1).astype(jnp.int32)
        ti = ei[1].reshape(-1).astype(jnp.int32)
        n_src = x_dict[src].shape[0]
        sdeg = jnp.bincount(si, length=n_src).astype(jnp.float32)
        tdeg = jnp.bincount(ti, length=n_tgt).astype(jnp.float32)
        # 1e-6 guard mirrors the module; it is never hit for nodes that
        # actually appear in the edge index, so it cannot amplify fp error.
        sdeg = jnp.where(sdeg == 0, 1e-6, sdeg)
        tdeg = jnp.where(tdeg == 0, 1e-6, tdeg)
        w = inv_div / jnp.sqrt(sdeg[si] * tdeg[ti])   # 1 / (div_all[e] * div[tgt])
        adj = adj.at[ti, si + src_offsets[src]].add(w)
    return adj.astype(dtype)


def precompute_hetero_gcn(x_dict, edge_index_dict, operand_dtype=jnp.bfloat16):
    div = defaultdict(int)
    for k in edge_index_dict.keys():
        div[k[-1]] += 1

    by_tgt = defaultdict(list)
    for key, ei in edge_index_dict.items():
        by_tgt[key[-1]].append((key[0], ei))

    itemsize = jnp.dtype(operand_dtype).itemsize
    m_align = 16 if itemsize < 4 else 8     # bf16 sublane packing needs 16 rows
    vmem_limit = _default_vmem_limit()

    plan = {}
    for tgt, rels in by_tgt.items():
        n_tgt, feat = x_dict[tgt].shape     # per-target feature width

        srcs = []
        for src, _ in rels:
            if src not in srcs:
                srcs.append(src)
            # Module scatters source rows into zeros_like(target_x), so source
            # and target feature widths must match per relation.
            assert x_dict[src].shape[1] == feat, (
                f"feature width mismatch: src={src} vs tgt={tgt}")

        src_offsets, off = {}, 0
        for src in srcs:
            src_offsets[src] = off
            off += x_dict[src].shape[0]
        k_total = off

        tm, _, m_pad = _even_tiles(n_tgt, TILE_M, m_align)
        tk, _, k_pad = _even_tiles(k_total, TILE_K, 128)
        tn, _, n_pad = _pick_tn(feat, tm, tk, itemsize, vmem_limit)

        adj = _build_stacked_adj(rels, x_dict, div[tgt], n_tgt, m_pad, k_pad,
                                 src_offsets, operand_dtype)

        plan[tgt] = dict(srcs=srcs, adj=adj, tm=tm, tn=tn, tk=tk,
                         m_pad=m_pad, n_pad=n_pad, k_pad=k_pad,
                         n_tgt=n_tgt, feat=feat, k_total=k_total)

    return {"plan": plan, "operand_dtype": operand_dtype,
            "vmem_limit": vmem_limit}


# ----------------------------------------------------------------------------
# Forward (module .forward equivalent)
# ----------------------------------------------------------------------------
def hetero_gcn_light_conv_forward(x_dict, precomp, relu_flag=True):
    # relu_flag kept for API parity: the module's first ReLU(out/div) is
    # unconditional and the optional second ReLU is idempotent, so one
    # in-kernel ReLU covers both cases.
    del relu_flag
    plan = precomp["plan"]
    op_dtype = precomp["operand_dtype"]
    vmem_limit = precomp["vmem_limit"]

    x_stack_cache = {}
    out = {}
    for tgt, e in plan.items():
        key = (tuple(e["srcs"]), e["k_pad"], e["n_pad"])
        if key not in x_stack_cache:
            xs = [x_dict[s].astype(op_dtype) for s in e["srcs"]]
            xcat = xs[0] if len(xs) == 1 else jnp.concatenate(xs, axis=0)
            x_stack_cache[key] = jnp.pad(
                xcat, ((0, e["k_pad"] - e["k_total"]),
                       (0, e["n_pad"] - e["feat"])))
        res = _fused_matmul(e["adj"], x_stack_cache[key],
                            tm=e["tm"], tn=e["tn"], tk=e["tk"],
                            apply_relu=True, vmem_limit=vmem_limit)
        out[tgt] = res[: e["n_tgt"], : e["feat"]]
    return out


# ----------------------------------------------------------------------------
# Pure-JAX reference (mirrors the PyTorch gather / scale / scatter semantics)
# ----------------------------------------------------------------------------
def reference_forward(x_dict, edge_index_dict, relu_flag):
    div = defaultdict(int)
    for k in edge_index_dict.keys():
        div[k[-1]] += 1
    out = {}
    for k, v in edge_index_dict.items():
        src, tgt = k[0], k[-1]
        sx, tx = x_dict[src], x_dict[tgt]
        si, ti = v[0].reshape(-1), v[1].reshape(-1)
        sdeg = jnp.bincount(si, length=sx.shape[0]).astype(jnp.float32)
        tdeg = jnp.bincount(ti, length=tx.shape[0]).astype(jnp.float32)
        sdeg = jnp.where(sdeg == 0, 1e-6, sdeg)
        tdeg = jnp.where(tdeg == 0, 1e-6, tdeg)
        div_all = jnp.sqrt(sdeg[si] * tdeg[ti])
        msg = sx[si] / div_all[:, None]
        agg = jax.ops.segment_sum(msg, ti, num_segments=tx.shape[0])
        out[tgt] = out[tgt] + agg if tgt in out else agg
    out = {k: jax.nn.relu(v / div[k]) for k, v in out.items()}
    if relu_flag:
        out = {k: jax.nn.relu(v) for k, v in out.items()}
    return out


# ----------------------------------------------------------------------------
if __name__ == "__main__":
    key = jax.random.PRNGKey(0)
    k_xu, k_xi, k_e1, k_e2, k_e3 = jax.random.split(key, 5)

    N_USER, N_ITEM, FEAT = 16, 24, 32

    x_dict = {
        "user": jax.random.normal(k_xu, (N_USER, FEAT), dtype=jnp.float32),
        "item": jax.random.normal(k_xi, (N_ITEM, FEAT), dtype=jnp.float32),
    }

    edge_index_dict = {
        ("user", "buys", "item"): jnp.stack(
            [jax.random.randint(k_e1, (40,), 0, N_USER),
             jax.random.randint(jax.random.fold_in(k_e1, 1), (40,), 0, N_ITEM)]),
        ("item", "rev_buys", "user"): jnp.stack(
            [jax.random.randint(k_e2, (40,), 0, N_ITEM),
             jax.random.randint(jax.random.fold_in(k_e2, 1), (40,), 0, N_USER)]),
        ("item", "similar", "item"): jnp.stack(
            [jax.random.randint(k_e3, (30,), 0, N_ITEM),
             jax.random.randint(jax.random.fold_in(k_e3, 1), (30,), 0, N_ITEM)]),
    }

    RELU_FLAG = True  # module's `ReLU` constructor arg
    ref = reference_forward(x_dict, edge_index_dict, RELU_FLAG)

    # --- f32 operand path (strict check, numerically sensitive uses) ---
    pre_f32 = precompute_hetero_gcn(x_dict, edge_index_dict,
                                    operand_dtype=jnp.float32)
    out_f32 = hetero_gcn_light_conv_forward(x_dict, pre_f32, RELU_FLAG)
    out_f32 = {k: jax.block_until_ready(v) for k, v in out_f32.items()}
    for k in ref:
        assert out_f32[k].shape == ref[k].shape and out_f32[k].dtype == ref[k].dtype
        assert jnp.allclose(out_f32[k], ref[k], rtol=1e-5, atol=1e-5), \
            f"f32 mismatch for {k}"

    # --- bf16 operand path (default; halves the dominant HBM stream; f32 acc) ---
    pre_bf16 = precompute_hetero_gcn(x_dict, edge_index_dict,
                                     operand_dtype=jnp.bfloat16)
    out_bf16 = hetero_gcn_light_conv_forward(x_dict, pre_bf16, RELU_FLAG)
    out_bf16 = {k: jax.block_until_ready(v) for k, v in out_bf16.items()}
    for k in ref:
        assert out_bf16[k].shape == ref[k].shape
        assert jnp.allclose(out_bf16[k], ref[k], rtol=3e-2, atol=3e-2), \
            f"bf16 mismatch for {k}"

    print("KERNEL_OK")
</pallas_src>

<mosaic_0001>
module attributes {stable_mosaic.version = 11 : i64} {
  func.func @_gcn_matmul_kernel(%arg0: i32, %arg1: i32, %arg2: i32, %arg3: memref<24x128xf32, #tpu.memory_space<vmem>>, %arg4: memref<128x128xf32, #tpu.memory_space<vmem>>, %arg5: memref<24x128xf32, #tpu.memory_space<vmem>>, %arg6: memref<24x128xf32, #tpu.memory_space<vmem>>) attributes {dimension_semantics = [#tpu.dimension_semantics<parallel>, #tpu.dimension_semantics<parallel>, #tpu.dimension_semantics<arbitrary>], iteration_bounds = array<i64: 1, 1, 1>, scalar_prefetch = 0 : i64, scratch_operands = 1 : i64, tpu.core_type = #tpu.core_type<tc>, window_params = [{transform_indices = @transform_0, window_bounds = array<i64: 24, 128>}, {transform_indices = @transform_1, window_bounds = array<i64: 128, 128>}, {transform_indices = @transform_2, window_bounds = array<i64: 24, 128>}]} {
    %c0_i32 = arith.constant 0 : i32
    %0 = arith.cmpi eq, %arg2, %c0_i32 : i32
    %1 = arith.extui %0 : i1 to i32
    %c0_i32_0 = arith.constant 0 : i32
    %2 = arith.cmpi ne, %1, %c0_i32_0 : i32
    scf.if %2 {
      %cst_10 = arith.constant 0.000000e+00 : f32
      %12 = vector.broadcast %cst_10 : f32 to vector<24x128xf32>
      %c0_11 = arith.constant 0 : index
      %c0_12 = arith.constant 0 : index
      %13 = vector.load %arg6[%c0_11, %c0_12] : memref<24x128xf32, #tpu.memory_space<vmem>>, vector<24x128xf32>
      tpu.vector_store %arg6[%c0_11, %c0_12], %12 {strides = array<i32>} : memref<24x128xf32, #tpu.memory_space<vmem>>, vector<24x128xf32>,
    } else {
    }
    %c0 = arith.constant 0 : index
    %c0_1 = arith.constant 0 : index
    %3 = vector.load %arg6[%c0, %c0_1] : memref<24x128xf32, #tpu.memory_space<vmem>>, vector<24x128xf32>
    %c0_2 = arith.constant 0 : index
    %c0_3 = arith.constant 0 : index
    %4 = vector.load %arg3[%c0_2, %c0_3] : memref<24x128xf32, #tpu.memory_space<vmem>>, vector<24x128xf32>
    %c0_4 = arith.constant 0 : index
    %c0_5 = arith.constant 0 : index
    %5 = vector.load %arg4[%c0_4, %c0_5] : memref<128x128xf32, #tpu.memory_space<vmem>>, vector<128x128xf32>
    %cst = arith.constant dense<0.000000e+00> : vector<24x128xf32>
    %6 = tpu.matmul %4, %5, %cst {dimension_numbers = #tpu.dot_dimension_numbers<[1], [0], [0], [1], [0, 0, 1, 1], [], []>} : vector<24x128xf32>, vector<128x128xf32>, vector<24x128xf32> -> vector<24x128xf32>
    %7 = arith.addf %3, %6 : vector<24x128xf32>
    %c0_6 = arith.constant 0 : index
    %c0_7 = arith.constant 0 : index
    %8 = vector.load %arg6[%c0_6, %c0_7] : memref<24x128xf32, #tpu.memory_space<vmem>>, vector<24x128xf32>
    tpu.vector_store %arg6[%c0_6, %c0_7], %7 {strides = array<i32>} : memref<24x128xf32, #tpu.memory_space<vmem>>, vector<24x128xf32>,
    %c0_i32_8 = arith.constant 0 : i32
    %9 = arith.cmpi eq, %arg2, %c0_i32_8 : i32
    %10 = arith.extui %9 : i1 to i32
    %c0_i32_9 = arith.constant 0 : i32
    %11 = arith.cmpi ne, %10, %c0_i32_9 : i32
    scf.if %11 {
      %c0_10 = arith.constant 0 : index
      %c0_11 = arith.constant 0 : index
      %12 = vector.load %arg6[%c0_10, %c0_11] : memref<24x128xf32, #tpu.memory_space<vmem>>, vector<24x128xf32>
      %cst_12 = arith.constant 0.000000e+00 : f32
      %13 = vector.broadcast %cst_12 : f32 to vector<24x128xf32>
      %14 = arith.maximumf %12, %13 : vector<24x128xf32>
      %c0_13 = arith.constant 0 : index
      %c0_14 = arith.constant 0 : index
      %15 = vector.load %arg5[%c0_13, %c0_14] : memref<24x128xf32, #tpu.memory_space<vmem>>, vector<24x128xf32>
      tpu.vector_store %arg5[%c0_13, %c0_14], %14 {strides = array<i32>} : memref<24x128xf32, #tpu.memory_space<vmem>>, vector<24x128xf32>,
    } else {
    }
    return
  }
  func.func @transform_0(%arg0: i32, %arg1: i32, %arg2: i32) -> (i32, i32) {
    %c0_i32 = arith.constant 0 : i32
    return %arg0, %arg2 : i32, i32
  }
  func.func @transform_1(%arg0: i32, %arg1: i32, %arg2: i32) -> (i32, i32) {
    %c0_i32 = arith.constant 0 : i32
    return %arg2, %arg1 : i32, i32
  }
  func.func @transform_2(%arg0: i32, %arg1: i32, %arg2: i32) -> (i32, i32) {
    %c0_i32 = arith.constant 0 : i32
    return %arg0, %arg1 : i32, i32
  }
}

</mosaic_0001>

<bundles_post_ra>
// kernel: tpu_custom_call.1
= control target key start
LH: loop header
LB: loop body
LE: loop exit
PB: predicated region body
PF: predicated region fallthrough
CT: control target
= control target key end

     0   :  { %7 = vsyncpa [#allocation4], 0  ;;  %s290_s0 = inlined_call_operand.hbm [shape: f32[24,128], index: 0, kind: input, shape index: {}]   ;;  %s291_s1 = inlined_call_operand.hbm [shape: f32[128,128], index: 1, kind: input, shape index: {}]   ;;  %s292_s2 = inlined_call_operand.hbm [shape: f32[24,128], index: 2, kind: output, shape index: {}]  }
   0x1   :  { %8 = vsyncpa [#allocation7], 0 }
   0x2   :  { %9 = vsyncpa [#allocation5], 0  ;;  %s14_s11 = sshll.u32 %s290_s0, 4  ;;  %s252_s12 = smov [#allocation3]   ;;  %s15_s11 = int_to_ptr.hbm [resolvable:$true] %s14_s11 }
   0x3   :  { %s16_s13 = sshll.u32 %s252_s12, 4  ;;  %s27_s16 = sshll.u32 %s291_s1, 4  ;;  %s17_s13 = int_to_ptr.vmem [resolvable:$true] %s16_s13  ;;  %s28_s16 = int_to_ptr.hbm [resolvable:$true] %s27_s16 }
   0x4   :  { %s253_s17 = smov 128   ;;  %s254_s18 = smov 8  }
   0x5   :  { %22 = dma.hbm_to_vmem [thread:$0]  %s15_s11, 384, %s17_s13, [#allocation4], %s253_s17, %s253_s17, %s254_s18  }
   0x6   :  { %s255_s19 = smov [#allocation6]  }
   0x7   :  { %s29_s20 = sshll.u32 %s255_s19, 4  ;;  %s30_s20 = int_to_ptr.vmem [resolvable:$true] %s29_s20 }
   0x8   :  { %35 = dma.hbm_to_vmem [thread:$0]  %s28_s16, 2048, %s30_s20, [#allocation7], %s253_s17, %s253_s17, %s254_s18  }
   0x9   :  { %246 = dma.done.wait [#allocation4], 384  }
   0xa   :  { %247 = vsyncadd [#allocation4], 4294966912 }
   0xb   :  { %248 = dma.done.wait [#allocation7], 2048  }
   0xc   :  { %249 = vsyncadd [#allocation7], 4294965248  ;;  %v72_v0 = vld [vmem:[#allocation6 + $0x78] sm:$0xff]  ;;  %v71_v1 = vld [vmem:[#allocation6 + $0x70] sm:$0xff]  ;;  %s256_s0 = smov [#allocation8]   ;;  %s123_s23 = sshll.u32 %s292_s2, 4  ;;  %s124_s23 = int_to_ptr.hbm [resolvable:$true] %s123_s23 }
   0xd   :  { %138 = vmatpush.msra.mxu2 %v72_v0  ;;  %73 = vmatpush.msra.mxu0 %v72_v0  ;;  %v70_v2 = vld [vmem:[#allocation6 + $0x68] sm:$0xff]  ;;  %v69_v3 = vld [vmem:[#allocation6 + $0x60] sm:$0xff]  ;;  %v68_v4 = vld [vmem:[#allocation6 + $0x58] sm:$0xff]  ;;  %s121_s1 = sshll.u32 %s256_s0, 4  ;;  %s122_s1 = int_to_ptr.vmem [resolvable:$true] %s121_s1 }
   0xe   :  { %137 = vmatpush.msra.mxu1 %v72_v0  ;;  %v67_v5 = vld [vmem:[#allocation6 + $0x50] sm:$0xff]  ;;  %v66_v6 = vld [vmem:[#allocation6 + $0x48] sm:$0xff]  ;;  %v65_v7 = vld [vmem:[#allocation6 + $0x40] sm:$0xff] }
   0xf   :  { %140 = vmatpush.msra.mxu2 %v71_v1  ;;  %74 = vmatpush.msra.mxu0 %v71_v1  ;;  %v64_v8 = vld [vmem:[#allocation6 + $0x38] sm:$0xff]  ;;  %v63_v9 = vld [vmem:[#allocation6 + $0x30] sm:$0xff]  ;;  %v62_v10 = vld [vmem:[#allocation6 + $0x28] sm:$0xff] }
  0x10   :  { %139 = vmatpush.msra.mxu1 %v71_v1  ;;  %v61_v11 = vld [vmem:[#allocation6 + $0x20] sm:$0xff]  ;;  %v60_v12 = vld [vmem:[#allocation6 + $0x18] sm:$0xff]  ;;  %v59_v13 = vld [vmem:[#allocation6 + $0x10] sm:$0xff] }
  0x11   :  { %142 = vmatpush.msra.mxu2 %v70_v2  ;;  %75 = vmatpush.msra.mxu0 %v70_v2  ;;  %v58_v14 = vld [vmem:[#allocation6 + $0x8] sm:$0xff]  ;;  %v57_v15 = vld [vmem:[#allocation6] sm:$0xff]  ;;  %v56_v16 = vld [vmem:[#allocation3 + $0x10] sm:$0xff] }
  0x12   :  { %141 = vmatpush.msra.mxu1 %v70_v2  ;;  %v54_v17 = vld [vmem:[#allocation3] sm:$0xff]  ;;  %v55_v18 = vld [vmem:[#allocation3 + $0x8] sm:$0xff] }
  0x13   :  { %144 = vmatpush.msra.mxu2 %v69_v3  ;;  %76 = vmatpush.msra.mxu0 %v69_v3 }
  0x14   :  { %143 = vmatpush.msra.mxu1 %v69_v3 }
  0x15   :  { %146 = vmatpush.msra.mxu2 %v68_v4  ;;  %77 = vmatpush.msra.mxu0 %v68_v4 }
  0x16   :  { %145 = vmatpush.msra.mxu1 %v68_v4 }
  0x17   :  { %148 = vmatpush.msra.mxu2 %v67_v5  ;;  %78 = vmatpush.msra.mxu0 %v67_v5 }
  0x18   :  { %147 = vmatpush.msra.mxu1 %v67_v5 }
  0x19   :  { %150 = vmatpush.msra.mxu2 %v66_v6  ;;  %79 = vmatpush.msra.mxu0 %v66_v6 }
  0x1a   :  { %149 = vmatpush.msra.mxu1 %v66_v6 }
  0x1b   :  { %152 = vmatpush.msra.mxu2 %v65_v7  ;;  %80 = vmatpush.msra.mxu0 %v65_v7 }
  0x1c   :  { %151 = vmatpush.msra.mxu1 %v65_v7 }
  0x1d   :  { %154 = vmatpush.msra.mxu2 %v64_v8  ;;  %81 = vmatpush.msra.mxu0 %v64_v8 }
  0x1e   :  { %153 = vmatpush.msra.mxu1 %v64_v8 }
  0x1f   :  { %156 = vmatpush.msra.mxu2 %v63_v9  ;;  %82 = vmatpush.msra.mxu0 %v63_v9 }
  0x20   :  { %155 = vmatpush.msra.mxu1 %v63_v9 }
  0x21   :  { %158 = vmatpush.msra.mxu2 %v62_v10  ;;  %83 = vmatpush.msra.mxu0 %v62_v10 }
  0x22   :  { %157 = vmatpush.msra.mxu1 %v62_v10 }
  0x23   :  { %160 = vmatpush.msra.mxu2 %v61_v11  ;;  %84 = vmatpush.msra.mxu0 %v61_v11 }
  0x24   :  { %159 = vmatpush.msra.mxu1 %v61_v11 }
  0x25   :  { %162 = vmatpush.msra.mxu2 %v60_v12  ;;  %85 = vmatpush.msra.mxu0 %v60_v12 }
  0x26   :  { %161 = vmatpush.msra.mxu1 %v60_v12 }
  0x27   :  { %164 = vmatpush.msra.mxu2 %v59_v13  ;;  %86 = vmatpush.msra.mxu0 %v59_v13 }
  0x28   :  { %163 = vmatpush.msra.mxu1 %v59_v13 }
  0x29   :  { %166 = vmatpush.msra.mxu2 %v58_v14  ;;  %87 = vmatpush.msra.mxu0 %v58_v14 }
  0x2a   :  { %165 = vmatpush.msra.mxu1 %v58_v14 }
  0x2b   :  { %168 = vmatpush.msra.mxu2 %v57_v15  ;;  %88 = vmatpush.msra.mxu0 %v57_v15 }
  0x2c   :  { %95 = vmatmul.f32.vlgmr.msra.gmra.mxu2 %v56_v16  ;;  %167 = vmatpush.msra.mxu1 %v57_v15 }
  0x2d   :  { %89 = vmatmul.f32.vlgmr.msra.gmra.mxu0 %v54_v17  ;;  %92 = vmatmul.f32.vlgmr.msra.gmra.mxu1 %v55_v18 }
  0xaa   :  { %v90_v19 = vpop.f32.mrf.mxu0  ;;  %v93_v20 = vpop.f32.mrf.mxu1 }
  0xab   :  { %v111_v21 = vmax.f32 %v90_v19, 0.0  ;;  %v112_v22 = vmax.f32 %v93_v20, 0.0 }
  0xad   :  { %114 = vst [vmem:[#allocation8] sm:$0xff] %v111_v21 }
  0xae   :  { %115 = vst [vmem:[#allocation8 + $0x8] sm:$0xff] %v112_v22 }
  0xaf   :  { %v96_v23 = vpop.f32.mrf.mxu2 }
  0xb0   :  { %v113_v24 = vmax.f32 %v96_v23, 0.0 }
  0xb2   :  { %116 = vst [vmem:[#allocation8 + $0x10] sm:$0xff] %v113_v24 }
  0xb3   :  { %129 = dma.vmem_to_hbm [thread:$0]  %s122_s1, 384, %s124_s23, [#allocation5], %s253_s17, %s253_s17, %s254_s18  }
  0xb4   :  { %250 = dma.done.wait [#allocation5], 384  }
  0xb5   :  { %251 = vsyncadd [#allocation5], 4294966912 }
  0xb6   :  { %134 = vsyncpa [#allocation4], 1 }
  0xb7   :  { %135 = vsyncpa [#allocation7], 1 }
  0xb8   :  { %136 = vsyncpa [#allocation5], 1 }

</bundles_post_ra>
